<compile_context>
chip_gen: v6e
topology: v6e:2x2x1
jax: 0.10.0
libtpu: 0.0.40
codegen_flags: <defaults>
</compile_context>

<pallas_src>
import functools
import math

import jax
import jax.numpy as jnp
from jax.experimental import pallas as pl
from jax.experimental.pallas import tpu as pltpu

_BN_EPS = 1e-5
_LANE = 128


# --------------------------------------------------------------------------- #
# Planning helpers                                                             #
# --------------------------------------------------------------------------- #
def _round_up(n, m):
    return ((n + m - 1) // m) * m


def _vmem_budget_bytes():
    """Per-kernel VMEM budget derived from the actual chip when possible."""
    try:
        cap = int(pltpu.get_tpu_info().vmem_capacity_bytes)
    except Exception:
        cap = 64 * 1024 * 1024          # conservative: v7x physical VMEM
    return (3 * cap) // 4               # headroom for compiler-internal scratch


def _tn_candidates(d_out_p):
    cands = [c for c in (512, 256, 128) if d_out_p % c == 0]
    # Prefer >= 2 feature tiles so the "parallel" feature axis can be sharded
    # across both TensorCores on v7x; among those prefer the largest tile.
    cands.sort(key=lambda c: (d_out_p // c < 2, -c))
    return cands or [d_out_p]


def _tk_candidates(d_in_p):
    cands = []
    if d_in_p <= 1024:
        cands.append(d_in_p)            # fold K: single reduction step
    cands += [c for c in (512, 256, 128) if d_in_p % c == 0 and c < d_in_p]
    return cands or [d_in_p]


def _plan_fused(B, d_in_p, d_out_p, x_itm, w_itm, o_itm, use_acc, budget):
    """Tiles for the single-kernel BN path (whole batch resident in VMEM)."""
    for tn in _tn_candidates(d_out_p):
        for tk in _tk_candidates(d_in_p):
            cost = (2 * B * d_in_p * x_itm        # resident activation (2 bufs, worst case)
                    + 2 * tk * tn * w_itm         # double-buffered weight tile
                    + 2 * B * tn * o_itm          # output tile
                    + (B * tn * 4 if use_acc else 0)
                    + 16 * tn)                    # per-feature params
            if cost <= budget:
                return tn, tk
    return None


def _plan_tiled(B, d_in_p, d_out_p, x_itm, w_itm, budget, max_tb):
    """Tiles for the batch-tiled paths.  Returns (tb, tn, tk, x_streamed)."""
    tb_cands = []
    if max_tb is None or max_tb >= B:
        tb_cands.append(B)                        # whole batch in one row block
    for c in (1024, 512, 256, 128, 64, 32, 16, 8):
        if c < B and (max_tb is None or c <= max_tb):
            tb_cands.append(c)
    if not tb_cands:
        tb_cands = [8]
    for tn in _tn_candidates(d_out_p):
        for streamed in (False, True):            # prefer a K-resident x row block
            for tb in tb_cands:
                for tk in _tk_candidates(d_in_p):
                    x_bytes = 2 * tb * (tk if streamed else d_in_p) * x_itm
                    cost = (x_bytes + 2 * tk * tn * w_itm
                            + 2 * tb * tn * 4 + 16 * tn)
                    if cost <= budget:
                        return tb, tn, tk, streamed
    return 8, 128, _tk_candidates(d_in_p)[-1], True


def _maybe_deep(shape, index_map, nk, rows):
    """Deeper pipelining when the per-step matmul is too short to hide the DMA."""
    if nk >= 3 and rows <= 256:
        return pl.BlockSpec(shape, index_map, pipeline_mode=pl.Buffered(3))
    return pl.BlockSpec(shape, index_map)


def _cparams(sems, budget):
    return pltpu.CompilerParams(dimension_semantics=sems, vmem_limit_bytes=budget)


# --------------------------------------------------------------------------- #
# Kernels                                                                      #
# --------------------------------------------------------------------------- #
def _x_chunk(x_ref, tk, k_axis, x_streamed, n_k):
    """Current K chunk of the activation tile."""
    if x_streamed or n_k == 1:
        return x_ref[...]
    k = pl.program_id(k_axis)
    return x_ref[:, pl.ds(pl.multiple_of(k * tk, tk), tk)]


def _bn_fused_kernel(tk, n_k, x_ref, wt_ref, gamma_ref, beta_ref, o_ref,
                     acc_ref=None):
    """grid = (feature tiles, K tiles); whole batch resident; BN fused in epilogue."""
    acc = o_ref if acc_ref is None else acc_ref
    k = pl.program_id(1)

    @pl.when(k == 0)
    def _init():
        acc[...] = jnp.zeros_like(acc)

    xk = _x_chunk(x_ref, tk, 1, False, n_k)
    acc[...] += jnp.dot(xk, wt_ref[...], preferred_element_type=jnp.float32)

    @pl.when(k == pl.num_programs(1) - 1)
    def _finalize():
        z = acc[...].astype(jnp.float32)
        mean = jnp.mean(z, axis=0, keepdims=True)
        zc = z - mean
        var = jnp.mean(zc * zc, axis=0, keepdims=True)    # biased variance (BN train)
        scale = gamma_ref[...].astype(jnp.float32) * jax.lax.rsqrt(var + _BN_EPS)
        shift = beta_ref[...].astype(jnp.float32)
        # TODO(synk): for very large resident batches, chunk this epilogue over row
        # blocks (fori_loop, unrolled) to bound vreg pressure.
        o_ref[...] = jnp.tanh(zc * scale + shift).astype(o_ref.dtype)


def _bias_tanh_kernel(tk, n_k, x_streamed, x_ref, wt_ref, b_ref, o_ref,
                      acc_ref=None):
    """grid = (batch tiles, feature tiles, K tiles); tanh(x @ W^T + b)."""
    acc = o_ref if acc_ref is None else acc_ref
    k = pl.program_id(2)

    @pl.when(k == 0)
    def _init():
        acc[...] = jnp.zeros_like(acc)

    xk = _x_chunk(x_ref, tk, 2, x_streamed, n_k)
    acc[...] += jnp.dot(xk, wt_ref[...], preferred_element_type=jnp.float32)

    @pl.when(k == pl.num_programs(2) - 1)
    def _finalize():
        o_ref[...] = jnp.tanh(acc[...].astype(jnp.float32)
                              + b_ref[...].astype(jnp.float32)).astype(o_ref.dtype)


def _fc_partial_stats_kernel(tk, n_k, x_streamed, x_ref, wt_ref, z_ref, ps_ref):
    """grid = (batch tiles, feature tiles, K tiles).
    Writes z = x @ W^T (f32, accumulated directly in the output block) and the
    per-(batch-tile, feature) partial sum / sum-of-squares."""
    k = pl.program_id(2)

    @pl.when(k == 0)
    def _init():
        z_ref[...] = jnp.zeros_like(z_ref)

    xk = _x_chunk(x_ref, tk, 2, x_streamed, n_k)
    z_ref[...] += jnp.dot(xk, wt_ref[...], preferred_element_type=jnp.float32)

    @pl.when(k == pl.num_programs(2) - 1)
    def _finalize():
        z = z_ref[...]
        s1 = jnp.sum(z, axis=0, keepdims=True)
        s2 = jnp.sum(z * z, axis=0, keepdims=True)
        ps_ref[...] = jnp.concatenate([s1, s2], axis=0)[None]


def _bn_apply_kernel(inv_b, z_ref, stats_ref, gamma_ref, beta_ref, o_ref):
    """grid = (batch tiles, feature tiles); normalize + affine + tanh."""
    z = z_ref[...]
    mean = stats_ref[0:1, :] * inv_b
    var = jnp.maximum(stats_ref[1:2, :] * inv_b - mean * mean, 0.0)
    scale = gamma_ref[...].astype(jnp.float32) * jax.lax.rsqrt(var + _BN_EPS)
    shift = beta_ref[...].astype(jnp.float32)
    o_ref[...] = jnp.tanh((z - mean) * scale + shift).astype(o_ref.dtype)


# --------------------------------------------------------------------------- #
# pallas_call wrappers                                                         #
# --------------------------------------------------------------------------- #
def _bn_fused_call(x, wt, gamma_p, beta_p, out_dtype, plan, use_acc, budget):
    B, d_in_p = x.shape
    d_out_p = wt.shape[1]
    tn, tk = plan
    nj, nk = d_out_p // tn, d_in_p // tk

    in_specs = [
        pl.BlockSpec((B, d_in_p), lambda j, k: (0, 0)),        # x: VMEM-resident
        _maybe_deep((tk, tn), lambda j, k: (k, j), nk, B),     # W^T tile (streamed)
        pl.BlockSpec((1, tn), lambda j, k: (0, j)),            # gamma
        pl.BlockSpec((1, tn), lambda j, k: (0, j)),            # beta
    ]
    out_spec = pl.BlockSpec((B, tn), lambda j, k: (0, j))
    scratch = [pltpu.VMEM((B, tn), jnp.float32)] if use_acc else []

    return pl.pallas_call(
        functools.partial(_bn_fused_kernel, tk, nk),
        out_shape=jax.ShapeDtypeStruct((B, d_out_p), out_dtype),
        grid_spec=pltpu.PrefetchScalarGridSpec(
            num_scalar_prefetch=0, grid=(nj, nk),
            in_specs=in_specs, out_specs=out_spec, scratch_shapes=scratch),
        compiler_params=_cparams(("parallel", "arbitrary"), budget),
    )(x, wt, gamma_p, beta_p)


def _bn_tiled_call(x, wt, gamma_p, beta_p, out_dtype, budget, max_tb):
    B, d_in_p = x.shape
    d_out_p = wt.shape[1]
    tb, tn, tk, x_streamed = _plan_tiled(B, d_in_p, d_out_p, x.dtype.itemsize,
                                         wt.dtype.itemsize, budget, max_tb)
    B_pad = B if tb == B else _round_up(B, tb)
    if B_pad != B:
        # Zero rows contribute 0 to both sum and sum-of-squares, so dividing the
        # reduced statistics by the true batch size keeps BN exact.
        x = jnp.pad(x, ((0, B_pad - B), (0, 0)))
    nb, nj, nk = B_pad // tb, d_out_p // tn, d_in_p // tk

    if x_streamed:
        x_spec = _maybe_deep((tb, tk), lambda b, j, k: (b, k), nk, tb)
    else:
        x_spec = pl.BlockSpec((tb, d_in_p), lambda b, j, k: (b, 0))
    wt_spec = _maybe_deep((tk, tn), lambda b, j, k: (k, j), nk, tb)

    # Pass 1: z = x @ W^T (f32) + partial per-feature stats per batch tile.
    z, pstats = pl.pallas_call(
        functools.partial(_fc_partial_stats_kernel, tk, nk, x_streamed),
        out_shape=(jax.ShapeDtypeStruct((B_pad, d_out_p), jnp.float32),
                   jax.ShapeDtypeStruct((nb, 2, d_out_p), jnp.float32)),
        grid_spec=pltpu.PrefetchScalarGridSpec(
            num_scalar_prefetch=0, grid=(nb, nj, nk),
            in_specs=[x_spec, wt_spec],
            out_specs=[pl.BlockSpec((tb, tn), lambda b, j, k: (b, j)),
                       pl.BlockSpec((1, 2, tn), lambda b, j, k: (b, 0, j))]),
        compiler_params=_cparams(("parallel", "parallel", "arbitrary"), budget),
    )(x, wt)

    stats = jnp.sum(pstats, axis=0)               # (2, d_out_p): [sum; sum-of-squares]

    # Pass 2: normalize + affine + tanh (elementwise over batch tiles).
    return pl.pallas_call(
        functools.partial(_bn_apply_kernel, float(1.0 / B)),
        out_shape=jax.ShapeDtypeStruct((B_pad, d_out_p), out_dtype),
        grid_spec=pltpu.PrefetchScalarGridSpec(
            num_scalar_prefetch=0, grid=(nb, nj),
            in_specs=[pl.BlockSpec((tb, tn), lambda b, j: (b, j)),
                      pl.BlockSpec((2, tn), lambda b, j: (0, j)),
                      pl.BlockSpec((1, tn), lambda b, j: (0, j)),
                      pl.BlockSpec((1, tn), lambda b, j: (0, j))],
            out_specs=pl.BlockSpec((tb, tn), lambda b, j: (b, j))),
        compiler_params=_cparams(("parallel", "parallel"), budget),
    )(z, stats, gamma_p, beta_p)


def _bias_tanh_call(x, wt, b_p, out_dtype, use_acc, budget, max_tb):
    B, d_in_p = x.shape
    d_out_p = wt.shape[1]
    tb, tn, tk, x_streamed = _plan_tiled(B, d_in_p, d_out_p, x.dtype.itemsize,
                                         wt.dtype.itemsize, budget, max_tb)
    B_pad = B if tb == B else _round_up(B, tb)
    if B_pad != B:
        x = jnp.pad(x, ((0, B_pad - B), (0, 0)))
    nb, nj, nk = B_pad // tb, d_out_p // tn, d_in_p // tk

    if x_streamed:
        x_spec = _maybe_deep((tb, tk), lambda b, j, k: (b, k), nk, tb)
    else:
        x_spec = pl.BlockSpec((tb, d_in_p), lambda b, j, k: (b, 0))
    in_specs = [x_spec,
                _maybe_deep((tk, tn), lambda b, j, k: (k, j), nk, tb),
                pl.BlockSpec((1, tn), lambda b, j, k: (0, j))]
    out_spec = pl.BlockSpec((tb, tn), lambda b, j, k: (b, j))
    scratch = [pltpu.VMEM((tb, tn), jnp.float32)] if use_acc else []

    return pl.pallas_call(
        functools.partial(_bias_tanh_kernel, tk, nk, x_streamed),
        out_shape=jax.ShapeDtypeStruct((B_pad, d_out_p), out_dtype),
        grid_spec=pltpu.PrefetchScalarGridSpec(
            num_scalar_prefetch=0, grid=(nb, nj, nk),
            in_specs=in_specs, out_specs=out_spec, scratch_shapes=scratch),
        compiler_params=_cparams(("parallel", "parallel", "arbitrary"), budget),
    )(x, wt, b_p)


# --------------------------------------------------------------------------- #
# Public API                                                                   #
# --------------------------------------------------------------------------- #
def prepare_params(w, b, gamma, beta):
    """One-time parameter preparation (hoisted out of the per-call path).

    w: (D_out, D_in) PyTorch layout -> wt: (D_in_p, D_out_p) zero-padded to lane
    multiples; b/gamma/beta padded and reshaped to (1, D_out_p).
    """
    d_out, d_in = w.shape
    d_in_p = _round_up(d_in, _LANE)
    d_out_p = _round_up(d_out, _LANE)
    wt = jnp.pad(w.T, ((0, d_in_p - d_in), (0, d_out_p - d_out)))
    b_p = jnp.pad(b, (0, d_out_p - d_out)).reshape(1, d_out_p)
    g_p = jnp.pad(gamma, (0, d_out_p - d_out), constant_values=1.0).reshape(1, d_out_p)
    beta_p = jnp.pad(beta, (0, d_out_p - d_out)).reshape(1, d_out_p)
    return wt, b_p, g_p, beta_p


@functools.partial(jax.jit, static_argnames=(
    "d_out", "do_norm", "use_bf16_mxu", "force_batch_tiled", "max_batch_block"))
def dense_batch_fc_tanh(x, wt, b_p, gamma_p, beta_p, *, d_out, do_norm=True,
                        use_bf16_mxu=False, force_batch_tiled=False,
                        max_batch_block=None):
    """x: (B, D_in); wt/b_p/gamma_p/beta_p from prepare_params()."""
    B, d_in = x.shape
    d_in_p, d_out_p = wt.shape
    out_dtype = x.dtype
    budget = _vmem_budget_bytes()

    # Zero-pad K so activation loads are full-width (numerically inert).
    if d_in_p != d_in:
        x = jnp.pad(x, ((0, 0), (0, d_in_p - d_in)))

    if use_bf16_mxu:                     # bf16 MXU operands, f32 accumulation
        x_in, wt_in = x.astype(jnp.bfloat16), wt.astype(jnp.bfloat16)
    else:
        x_in, wt_in = x, wt
    x_itm, w_itm, o_itm = x_in.dtype.itemsize, wt_in.dtype.itemsize, out_dtype.itemsize
    use_acc = out_dtype != jnp.float32   # f32 output -> accumulate straight in o_ref

    if do_norm:
        plan = None
        if not force_batch_tiled and (max_batch_block is None or max_batch_block >= B):
            plan = _plan_fused(B, d_in_p, d_out_p, x_itm, w_itm, o_itm, use_acc, budget)
        if plan is not None:
            out = _bn_fused_call(x_in, wt_in, gamma_p, beta_p, out_dtype, plan,
                                 use_acc, budget)
        else:
            out = _bn_tiled_call(x_in, wt_in, gamma_p, beta_p, out_dtype, budget,
                                 max_batch_block)
    else:
        out = _bias_tanh_call(x_in, wt_in, b_p, out_dtype, use_acc, budget,
                              max_batch_block)
    return out[:B, :d_out]


def reference(x, w, b, gamma, beta, do_norm):
    z = x @ w.T + b
    if do_norm:
        mean = jnp.mean(z, axis=0, keepdims=True)
        var = jnp.mean((z - mean) ** 2, axis=0, keepdims=True)
        z = (z - mean) / jnp.sqrt(var + _BN_EPS)
        z = z * gamma + beta
    return jnp.tanh(z)


if __name__ == "__main__":
    def make_case(key, batch, d_in, d_out):
        kx, kw, kb = jax.random.split(key, 3)
        bound = 1.0 / math.sqrt(d_in)   # PyTorch nn.Linear default init range
        x = jax.random.normal(kx, (batch, d_in), jnp.float32)
        w = jax.random.uniform(kw, (d_out, d_in), jnp.float32, -bound, bound)
        b = jax.random.uniform(kb, (d_out,), jnp.float32, -bound, bound)
        gamma = jnp.ones((d_out,), jnp.float32)   # BatchNorm1d default affine
        beta = jnp.zeros((d_out,), jnp.float32)
        return x, w, b, gamma, beta

    # Case 1/2: small module-scale shapes -> fused single-kernel path.
    x, w, b, gamma, beta = make_case(jax.random.PRNGKey(0), 8, 32, 32)
    params = prepare_params(w, b, gamma, beta)

    out = dense_batch_fc_tanh(x, *params, d_out=32, do_norm=True)
    jax.block_until_ready(out)
    assert out.shape == (8, 32)
    assert jnp.allclose(out, reference(x, w, b, gamma, beta, True),
                        atol=1e-4, rtol=1e-4)

    out = dense_batch_fc_tanh(x, *params, d_out=32, do_norm=False)
    jax.block_until_ready(out)
    assert jnp.allclose(out, reference(x, w, b, gamma, beta, False),
                        atol=1e-4, rtol=1e-4)

    # Case 3/4: exercise the batch-tiled (large-batch) code paths at small scale,
    # with ragged batch / feature / K dims to cover the padding logic.
    x2, w2, b2, gamma2, beta2 = make_case(jax.random.PRNGKey(1), 100, 160, 192)
    params2 = prepare_params(w2, b2, gamma2, beta2)

    out2 = dense_batch_fc_tanh(x2, *params2, d_out=192, do_norm=True,
                               force_batch_tiled=True, max_batch_block=32)
    jax.block_until_ready(out2)
    assert out2.shape == (100, 192)
    assert jnp.allclose(out2, reference(x2, w2, b2, gamma2, beta2, True),
                        atol=1e-4, rtol=1e-4)

    out2 = dense_batch_fc_tanh(x2, *params2, d_out=192, do_norm=False,
                               max_batch_block=32)
    jax.block_until_ready(out2)
    assert jnp.allclose(out2, reference(x2, w2, b2, gamma2, beta2, False),
                        atol=1e-4, rtol=1e-4)

    print("KERNEL_OK")
</pallas_src>

<mosaic_0001>
module attributes {stable_mosaic.version = 11 : i64} {
  func.func @_bn_fused_kernel(%arg0: i32, %arg1: i32, %arg2: memref<8x128xf32, #tpu.memory_space<vmem>>, %arg3: memref<128x128xf32, #tpu.memory_space<vmem>>, %arg4: memref<1x128xf32, #tpu.memory_space<vmem>>, %arg5: memref<1x128xf32, #tpu.memory_space<vmem>>, %arg6: memref<8x128xf32, #tpu.memory_space<vmem>>) attributes {dimension_semantics = [#tpu.dimension_semantics<parallel>, #tpu.dimension_semantics<arbitrary>], iteration_bounds = array<i64: 1, 1>, scalar_prefetch = 0 : i64, scratch_operands = 0 : i64, tpu.core_type = #tpu.core_type<tc>, window_params = [{pipeline_mode = #tpu.pipeline_mode<synchronous>, transform_indices = @transform_0, window_bounds = array<i64: 8, 128>}, {transform_indices = @transform_1, window_bounds = array<i64: 128, 128>}, {transform_indices = @transform_2, window_bounds = array<i64: 1, 128>}, {transform_indices = @transform_3, window_bounds = array<i64: 1, 128>}, {transform_indices = @transform_4, window_bounds = array<i64: 8, 128>}]} {
    %c0_i32 = arith.constant 0 : i32
    %0 = arith.cmpi eq, %arg1, %c0_i32 : i32
    %1 = arith.extui %0 : i1 to i32
    %c0_i32_0 = arith.constant 0 : i32
    %2 = arith.cmpi ne, %1, %c0_i32_0 : i32
    scf.if %2 {
      %cst_10 = arith.constant 0.000000e+00 : f32
      %12 = vector.broadcast %cst_10 : f32 to vector<8x128xf32>
      %c0_11 = arith.constant 0 : index
      %c0_12 = arith.constant 0 : index
      %13 = vector.load %arg6[%c0_11, %c0_12] : memref<8x128xf32, #tpu.memory_space<vmem>>, vector<8x128xf32>
      tpu.vector_store %arg6[%c0_11, %c0_12], %12 {strides = array<i32>} : memref<8x128xf32, #tpu.memory_space<vmem>>, vector<8x128xf32>,
    } else {
    }
    %c0 = arith.constant 0 : index
    %c0_1 = arith.constant 0 : index
    %3 = vector.load %arg2[%c0, %c0_1] : memref<8x128xf32, #tpu.memory_space<vmem>>, vector<8x128xf32>
    %c0_2 = arith.constant 0 : index
    %c0_3 = arith.constant 0 : index
    %4 = vector.load %arg6[%c0_2, %c0_3] : memref<8x128xf32, #tpu.memory_space<vmem>>, vector<8x128xf32>
    %c0_4 = arith.constant 0 : index
    %c0_5 = arith.constant 0 : index
    %5 = vector.load %arg3[%c0_4, %c0_5] : memref<128x128xf32, #tpu.memory_space<vmem>>, vector<128x128xf32>
    %cst = arith.constant dense<0.000000e+00> : vector<8x128xf32>
    %6 = tpu.matmul %3, %5, %cst {dimension_numbers = #tpu.dot_dimension_numbers<[1], [0], [0], [1], [0, 0, 1, 1], [], []>} : vector<8x128xf32>, vector<128x128xf32>, vector<8x128xf32> -> vector<8x128xf32>
    %7 = arith.addf %4, %6 : vector<8x128xf32>
    %c0_6 = arith.constant 0 : index
    %c0_7 = arith.constant 0 : index
    %8 = vector.load %arg6[%c0_6, %c0_7] : memref<8x128xf32, #tpu.memory_space<vmem>>, vector<8x128xf32>
    tpu.vector_store %arg6[%c0_6, %c0_7], %7 {strides = array<i32>} : memref<8x128xf32, #tpu.memory_space<vmem>>, vector<8x128xf32>,
    %c0_i32_8 = arith.constant 0 : i32
    %9 = arith.cmpi eq, %arg1, %c0_i32_8 : i32
    %10 = arith.extui %9 : i1 to i32
    %c0_i32_9 = arith.constant 0 : i32
    %11 = arith.cmpi ne, %10, %c0_i32_9 : i32
    scf.if %11 {
      %c0_10 = arith.constant 0 : index
      %c0_11 = arith.constant 0 : index
      %12 = vector.load %arg6[%c0_10, %c0_11] : memref<8x128xf32, #tpu.memory_space<vmem>>, vector<8x128xf32>
      %cst_12 = arith.constant dense<0.000000e+00> : vector<128xf32>
      %13 = vector.multi_reduction <add>, %12, %cst_12 [0] : vector<8x128xf32> to vector<128xf32>
      %14 = vector.shape_cast %13 : vector<128xf32> to vector<1x128xf32>
      %cst_13 = arith.constant 8.000000e+00 : f32
      %15 = vector.broadcast %cst_13 : f32 to vector<1x128xf32>
      %16 = arith.divf %14, %15 : vector<1x128xf32>
      %17 = vector.broadcast %16 : vector<1x128xf32> to vector<8x128xf32>
      %18 = arith.subf %12, %17 : vector<8x128xf32>
      %19 = arith.mulf %18, %18 : vector<8x128xf32>
      %cst_14 = arith.constant dense<0.000000e+00> : vector<128xf32>
      %20 = vector.multi_reduction <add>, %19, %cst_14 [0] : vector<8x128xf32> to vector<128xf32>
      %21 = vector.shape_cast %20 : vector<128xf32> to vector<1x128xf32>
      %cst_15 = arith.constant 8.000000e+00 : f32
      %22 = vector.broadcast %cst_15 : f32 to vector<1x128xf32>
      %23 = arith.divf %21, %22 : vector<1x128xf32>
      %c0_16 = arith.constant 0 : index
      %c0_17 = arith.constant 0 : index
      %24 = vector.load %arg4[%c0_16, %c0_17] : memref<1x128xf32, #tpu.memory_space<vmem>>, vector<1x128xf32>
      %cst_18 = arith.constant 9.99999974E-6 : f32
      %25 = vector.broadcast %cst_18 : f32 to vector<1x128xf32>
      %26 = arith.addf %23, %25 : vector<1x128xf32>
      %27 = math.rsqrt %26 : vector<1x128xf32>
      %28 = arith.mulf %24, %27 : vector<1x128xf32>
      %c0_19 = arith.constant 0 : index
      %c0_20 = arith.constant 0 : index
      %29 = vector.load %arg5[%c0_19, %c0_20] : memref<1x128xf32, #tpu.memory_space<vmem>>, vector<1x128xf32>
      %30 = vector.broadcast %28 : vector<1x128xf32> to vector<8x128xf32>
      %31 = arith.mulf %18, %30 : vector<8x128xf32>
      %32 = vector.broadcast %29 : vector<1x128xf32> to vector<8x128xf32>
      %33 = arith.addf %31, %32 : vector<8x128xf32>
      %34 = math.tanh %33 : vector<8x128xf32>
      %c0_21 = arith.constant 0 : index
      %c0_22 = arith.constant 0 : index
      %35 = vector.load %arg6[%c0_21, %c0_22] : memref<8x128xf32, #tpu.memory_space<vmem>>, vector<8x128xf32>
      tpu.vector_store %arg6[%c0_21, %c0_22], %34 {strides = array<i32>} : memref<8x128xf32, #tpu.memory_space<vmem>>, vector<8x128xf32>,
    } else {
    }
    return
  }
  func.func @transform_0(%arg0: i32, %arg1: i32) -> (i32, i32) {
    %c0_i32 = arith.constant 0 : i32
    %c0_i32_0 = arith.constant 0 : i32
    %c0_i32_1 = arith.constant 0 : i32
    return %c0_i32, %c0_i32_0 : i32, i32
  }
  func.func @transform_1(%arg0: i32, %arg1: i32) -> (i32, i32) {
    %c0_i32 = arith.constant 0 : i32
    return %arg1, %arg0 : i32, i32
  }
  func.func @transform_2(%arg0: i32, %arg1: i32) -> (i32, i32) {
    %c0_i32 = arith.constant 0 : i32
    %c0_i32_0 = arith.constant 0 : i32
    return %c0_i32, %arg0 : i32, i32
  }
  func.func @transform_3(%arg0: i32, %arg1: i32) -> (i32, i32) {
    %c0_i32 = arith.constant 0 : i32
    %c0_i32_0 = arith.constant 0 : i32
    return %c0_i32, %arg0 : i32, i32
  }
  func.func @transform_4(%arg0: i32, %arg1: i32) -> (i32, i32) {
    %c0_i32 = arith.constant 0 : i32
    %c0_i32_0 = arith.constant 0 : i32
    return %c0_i32, %arg0 : i32, i32
  }
}

</mosaic_0001>

<bundles_post_ra>
// kernel: dense_batch_fc_tanh.1
= control target key start
LH: loop header
LB: loop body
LE: loop exit
PB: predicated region body
PF: predicated region fallthrough
CT: control target
= control target key end

     0   :  { %9 = vsyncpa [#allocation3], 0  ;;  %s337_s0 = inlined_call_operand.vmem [shape: f32[8,128], index: 0, kind: input, shape index: {}]   ;;  %s338_s1 = inlined_call_operand.hbm [shape: f32[128,128], index: 1, kind: input, shape index: {}]   ;;  %s339_s2 = inlined_call_operand.vmem [shape: f32[1,128], index: 2, kind: input, shape index: {}]   ;;  %s340_s3 = inlined_call_operand.vmem [shape: f32[1,128], index: 3, kind: input, shape index: {}]   ;;  %s341_s4 = inlined_call_operand.hbm [shape: f32[8,128], index: 4, kind: output, shape index: {}]  }
   0x1   :  { %10 = vsyncpa [#allocation4], 0  ;;  %s291_s15 = smov [#allocation2]  }
   0x2   :  { %s18_s16 = sshll.u32 %s291_s15, 4  ;;  %s19_s16 = int_to_ptr.vmem [resolvable:$true] %s18_s16 }
   0x3   :  { %s255_s17 = scalar_lea.vmem %s19_s16, 2048  ;;  %p260_p1 = scmp.lt.s32.totalorder %s19_s16, %s19_s16 }
   0x4   :  { %p256_p0 = scmp.ne.s32.totalorder %s19_s16, %s255_s17  ;;  %p261_p2 = scmp.lt.s32.totalorder %s255_s17, %s255_s17 }
   0x6   :  { %p262_p3 = por %p261_p2, %p260_p1 }
   0x8   :  { %p263_p4 = pnand %p262_p3, %p256_p0 }
   0xa   :  { %266 = shalt.err (!%p263_p4)
}
   0xb   :  { %s292_s18 = smov 128   ;;  %s293_s19 = smov 8  }
   0xc   :  { %24 = dma.hbm_to_vmem [thread:$0]  %s338_s1, 2048, %s19_s16, [#allocation3], %s292_s18, %s292_s18, %s293_s19  }
   0xd   :  { %287 = dma.done.wait [#allocation3], 2048  }
   0xe   :  { %288 = vsyncadd [#allocation3], 4294965248  ;;  %v294_v0 = vmov 0.0   ;;  %vm295_vm0 = vmmov 0   ;;  %v54_v1 = vld [vmem:[#allocation2 + $0x78] sm:$0xff]  ;;  %v53_v2 = vld [vmem:[#allocation2 + $0x70] sm:$0xff]  ;;  %v154_v37 = vlaneseq }
   0xf   :  { %202 = vmatprep.subr.mxu0 %v294_v0  ;;  %234 = vmatprep.mubr.msk.f32.mxu0 %vm295_vm0, %v294_v0  ;;  %v52_v3 = vld [vmem:[#allocation2 + $0x68] sm:$0xff]  ;;  %v51_v4 = vld [vmem:[#allocation2 + $0x60] sm:$0xff]  ;;  %v50_v5 = vld [vmem:[#allocation2 + $0x58] sm:$0xff]  ;;  %s296_s26 = smov [#allocation5]  }
  0x10   :  { %203 = vmatpush3.msra.mxu0 %v54_v1  ;;  %v49_v6 = vld [vmem:[#allocation2 + $0x50] sm:$0xff]  ;;  %v48_v7 = vld [vmem:[#allocation2 + $0x48] sm:$0xff]  ;;  %v47_v8 = vld [vmem:[#allocation2 + $0x40] sm:$0xff]  ;;  %v155_v38 = vshrl.u32 %v154_v37, 7  ;;  %s175_s27 = sshll.u32 %s296_s26, 4  ;;  %s176_s27 = int_to_ptr.vmem [resolvable:$true] %s175_s27 }
  0x11   :  { %204 = vmatprep.subr.mxu0 %v294_v0  ;;  %v46_v9 = vld [vmem:[#allocation2 + $0x38] sm:$0xff]  ;;  %v45_v10 = vld [vmem:[#allocation2 + $0x30] sm:$0xff]  ;;  %v44_v11 = vld [vmem:[#allocation2 + $0x28] sm:$0xff]  ;;  %s267_s28 = scalar_lea.vmem %s176_s27, 128  ;;  %p272_p6 = scmp.lt.s32.totalorder %s176_s27, %s176_s27 }
  0x12   :  { %205 = vmatpush3.msra.mxu0 %v53_v2  ;;  %v43_v12 = vld [vmem:[#allocation2 + $0x20] sm:$0xff]  ;;  %v42_v13 = vld [vmem:[#allocation2 + $0x18] sm:$0xff]  ;;  %v41_v14 = vld [vmem:[#allocation2 + $0x10] sm:$0xff]  ;;  %v156_v40 = vsub.s32 0, %v155_v38  ;;  %p268_p5 = scmp.ne.s32.totalorder %s176_s27, %s267_s28  ;;  %p273_p7 = scmp.lt.s32.totalorder %s267_s28, %s267_s28 }
  0x13   :  { %206 = vmatprep.subr.mxu0 %v294_v0  ;;  %v40_v15 = vld [vmem:[#allocation2 + $0x8] sm:$0xff]  ;;  %v39_v16 = vld [vmem:[#allocation2] sm:$0xff] }
  0x14   :  { %207 = vmatpush3.msra.mxu0 %v52_v3  ;;  %v37_v17 = vld [vmem:[%s337_s0] sm:$0xff]  ;;  %p274_p8 = por %p273_p7, %p272_p6 }
  0x15   :  { %208 = vmatprep.subr.mxu0 %v294_v0  ;;  %v148_v39 = vld [vmem:[%s339_s2] sm:$0x1] }
  0x16   :  { %209 = vmatpush3.msra.mxu0 %v51_v4  ;;  %v184_v44 = vld [vmem:[%s340_s3] ss:$0 sm:$0xff]  ;;  %p275_p9 = pnand %p274_p8, %p268_p5 }
  0x17   :  { %210 = vmatprep.subr.mxu0 %v294_v0 }
  0x18   :  { %211 = vmatpush3.msra.mxu0 %v50_v5 }
  0x19   :  { %212 = vmatprep.subr.mxu0 %v294_v0 }
  0x1a   :  { %213 = vmatpush3.msra.mxu0 %v49_v6 }
  0x1b   :  { %214 = vmatprep.subr.mxu0 %v294_v0 }
  0x1c   :  { %215 = vmatpush3.msra.mxu0 %v48_v7 }
  0x1d   :  { %216 = vmatprep.subr.mxu0 %v294_v0 }
  0x1e   :  { %217 = vmatpush3.msra.mxu0 %v47_v8 }
  0x1f   :  { %218 = vmatprep.subr.mxu0 %v294_v0 }
  0x20   :  { %219 = vmatpush3.msra.mxu0 %v46_v9 }
  0x21   :  { %220 = vmatprep.subr.mxu0 %v294_v0 }
  0x22   :  { %221 = vmatpush3.msra.mxu0 %v45_v10 }
  0x23   :  { %222 = vmatprep.subr.mxu0 %v294_v0 }
  0x24   :  { %223 = vmatpush3.msra.mxu0 %v44_v11 }
  0x25   :  { %224 = vmatprep.subr.mxu0 %v294_v0 }
  0x26   :  { %225 = vmatpush3.msra.mxu0 %v43_v12 }
  0x27   :  { %226 = vmatprep.subr.mxu0 %v294_v0 }
  0x28   :  { %227 = vmatpush3.msra.mxu0 %v42_v13 }
  0x29   :  { %228 = vmatprep.subr.mxu0 %v294_v0 }
  0x2a   :  { %229 = vmatpush3.msra.mxu0 %v41_v14 }
  0x2b   :  { %230 = vmatprep.subr.mxu0 %v294_v0 }
  0x2c   :  { %231 = vmatpush3.msra.mxu0 %v40_v15 }
  0x2d   :  { %232 = vmatprep.subr.mxu0 %v294_v0 }
  0x2e   :  { %233 = vmatpush3.msra.mxu0 %v39_v16 }
  0x2f   :  { %235 = vmatmul.mubr.f32.vlgmr.msra.gmra.mxu0 %v37_v17 }
  0xef   :  { %v121_v18 = vpop.f32.mrf.mxu0 }
  0xf0   :  { %v131_v20 = vrot.slane %v121_v18, 4 }
  0xf1   :  { %v236_v19 = vpop.f32.mrf.mxu0 }
  0xf2   :  { %v132_v21 = vadd.f32 %v131_v20, %v121_v18 }
  0xf4   :  { %v133_v22 = vrot.slane %v132_v21, 2 }
  0xf6   :  { %v134_v23 = vadd.f32 %v133_v22, %v132_v21 }
  0xf8   :  { %v135_v24 = vrot.slane %v134_v23, 1 }
  0xfa   :  { %v136_v25 = vadd.f32 %v135_v24, %v134_v23 }
  0xfc   :  { %v138_v26 = vmul.f32 0.125, %v136_v25 }
  0xfe   :  { %v139_v27 = vsub.f32 %v121_v18, %v138_v26 }
 0x100   :  { %v140_v28 = vmul.f32 %v139_v27, %v139_v27 }
 0x102   :  { %v141_v29 = vrot.slane %v140_v28, 4 }
 0x104   :  { %v142_v30 = vadd.f32 %v141_v29, %v140_v28 }
 0x106   :  { %v143_v31 = vrot.slane %v142_v30, 2 }
 0x108   :  { %v144_v32 = vadd.f32 %v143_v31, %v142_v30 }
 0x10a   :  { %v145_v33 = vrot.slane %v144_v32, 1 }
 0x10c   :  { %v146_v34 = vadd.f32 %v145_v33, %v144_v32 }
 0x10e   :  { %v147_v35 = vmul.f32 0.125, %v146_v34 }
 0x110   :  { %v149_v36 = vadd.f32 1e-05, %v147_v35 }
 0x112   :  { %243 = vrsqrt.f32 %v149_v36 }
 0x11f   :  { %v244_v41 = vpop.eup %243 }
 0x120   :  { %v151_v42 = vmul.f32 %v244_v41, %v148_v39 }
 0x122   :  { %v157_v43 = vrot.slane %v151_v42, %v156_v40 }
 0x124   :  { %v159_v45 = vmul.f32 %v157_v43, %v139_v27 }
 0x126   :  { %v166_v46 = vadd.f32 %v184_v44, %v159_v45 }
 0x128   :  { %245 = vtanh.f32 %v166_v46 }
 0x135   :  { %v246_v47 = vpop.eup %245 }
 0x136   :  { %168 = vst [vmem:[#allocation5] sm:$0xff] %v246_v47 }
 0x137   :  { %278 = shalt.err (!%p275_p9)
}
 0x138   :  { %178 = dma.vmem_to_hbm [thread:$0]  %s176_s27, 128, %s341_s4, [#allocation4]  }
 0x139   :  { %289 = dma.done.wait [#allocation4], 128  }
 0x13a   :  { %290 = vsyncadd [#allocation4], 4294967168 }
 0x13b   :  { %182 = vsyncpa [#allocation3], 1 }
 0x13c   :  { %183 = vsyncpa [#allocation4], 1 }

</bundles_post_ra>
